<compile_context>
chip_gen: v6e
topology: v6e:2x2x1
jax: 0.10.0
libtpu: 0.0.40
codegen_flags: <defaults>
</compile_context>

<pallas_src>
import jax
import jax.numpy as jnp
from jax.experimental import pallas as pl
from jax.experimental.pallas import tpu as pltpu


# ----------------------------- Pallas kernel ------------------------------- #

def text_rnn_kernel(ids_ref,      # SMEM (B,)            int32 token ids
                    embed_ref,    # VMEM (V, H)           f32 embedding table
                    w_ref,        # VMEM (L, 2H, 4H)      bf16 stacked [Wih; Whh]
                    b_ref,        # VMEM (L, 1, 4H)       f32 (b_ih + b_hh)
                    fcw_ref,      # VMEM (H, O)           bf16 fc weight (transposed)
                    fcb_ref,      # VMEM (1, O)           f32 fc bias
                    h_in_ref,     # VMEM (L, B, H)        f32
                    c_in_ref,     # VMEM (L, B, H)        f32
                    logits_ref,   # VMEM (B, O)           f32 out
                    h_out_ref,    # VMEM (L, B, H)        f32 out (aliased to h_in)
                    c_out_ref,    # VMEM (L, B, H)        f32 out (aliased to c_in)
                    xh_ref):      # VMEM (B, 2H)          bf16 scratch
    L, B, H = h_in_ref.shape

    # ---- Embedding gather (ids are scalars in SMEM; rows gathered in VMEM) ----
    for b in range(B):                       # B is small & static -> unrolled
        tok = ids_ref[b]                                     # scalar int32
        row = embed_ref[pl.ds(tok, 1), :]                    # (1, H) f32
        xh_ref[b:b + 1, 0:H] = row.astype(jnp.bfloat16)

    # ---- Stacked single-timestep LSTM layers (merged [x,h] @ [Wih;Whh]) ----
    last_h = None
    for l in range(L):                       # L is small & static -> unrolled
        xh_ref[:, H:2 * H] = h_in_ref[l].astype(jnp.bfloat16)
        gates = (jnp.dot(xh_ref[...], w_ref[l],
                         preferred_element_type=jnp.float32)
                 + b_ref[l])                                  # (B, 4H) f32
        i = jax.nn.sigmoid(gates[:, 0 * H:1 * H])
        f = jax.nn.sigmoid(gates[:, 1 * H:2 * H])
        g = jnp.tanh(gates[:, 2 * H:3 * H])
        o = jax.nn.sigmoid(gates[:, 3 * H:4 * H])
        c_new = f * c_in_ref[l] + i * g
        h_new = o * jnp.tanh(c_new)
        h_out_ref[l] = h_new
        c_out_ref[l] = c_new
        if l + 1 < L:
            xh_ref[:, 0:H] = h_new.astype(jnp.bfloat16)       # feed next layer
        last_h = h_new

    # ---- FC head on the top-layer hidden (seq_len == 1 so reshape is a no-op) ----
    logits_ref[...] = (jnp.dot(last_h.astype(jnp.bfloat16), fcw_ref[...],
                               preferred_element_type=jnp.float32)
                       + fcb_ref[...])


# ------------------------------ Wrapper ------------------------------------ #

def text_rnn_forward(params, x, hidden, cell):
    """Equivalent of TextRNN.forward(x, hidden, cell).

    x:      (B,) int32 token ids
    hidden: (L, B, H) f32
    cell:   (L, B, H) f32
    returns (logits (B, O), (hidden', cell'))
    """
    L, B, H = hidden.shape
    O = params["fc_w"].shape[1]
    vmem = pl.BlockSpec(memory_space=pltpu.MemorySpace.VMEM)
    smem = pl.BlockSpec(memory_space=pltpu.MemorySpace.SMEM)

    logits, h_new, c_new = pl.pallas_call(
        text_rnn_kernel,
        in_specs=[smem, vmem, vmem, vmem, vmem, vmem, vmem, vmem],
        out_specs=(vmem, vmem, vmem),
        out_shape=(jax.ShapeDtypeStruct((B, O), jnp.float32),
                   jax.ShapeDtypeStruct((L, B, H), jnp.float32),
                   jax.ShapeDtypeStruct((L, B, H), jnp.float32)),
        scratch_shapes=[pltpu.VMEM((B, 2 * H), jnp.bfloat16)],
        # hidden (arg 6) -> h_out (out 1), cell (arg 7) -> c_out (out 2)
        input_output_aliases={6: 1, 7: 2},
    )(x, params["embed"], params["w"], params["b"],
      params["fc_w"], params["fc_b"], hidden, cell)
    return logits, (h_new, c_new)


def init_params(key, input_size, hidden_size, num_layers, output_size):
    """Synthetic init mimicking PyTorch uniform(-1/sqrt(H), 1/sqrt(H)) for LSTM/FC."""
    H = hidden_size
    k = 1.0 / jnp.sqrt(jnp.float32(H))
    keys = jax.random.split(key, 3 + 4 * num_layers)
    w_list, b_list = [], []
    for l in range(num_layers):
        kw = keys[3 + 4 * l: 3 + 4 * (l + 1)]
        wih_t = jax.random.uniform(kw[0], (H, 4 * H), jnp.float32, -k, k)
        whh_t = jax.random.uniform(kw[1], (H, 4 * H), jnp.float32, -k, k)
        b_ih = jax.random.uniform(kw[2], (4 * H,), jnp.float32, -k, k)
        b_hh = jax.random.uniform(kw[3], (4 * H,), jnp.float32, -k, k)
        w_list.append(jnp.concatenate([wih_t, whh_t], axis=0).astype(jnp.bfloat16))
        b_list.append((b_ih + b_hh).reshape(1, 4 * H))
    return {
        "embed": jax.random.normal(keys[0], (input_size, H), jnp.float32),
        "w": jnp.stack(w_list, axis=0),           # (L, 2H, 4H) bf16
        "b": jnp.stack(b_list, axis=0),           # (L, 1, 4H)  f32
        "fc_w": jax.random.uniform(keys[1], (H, output_size),
                                   jnp.float32, -k, k).astype(jnp.bfloat16),
        "fc_b": jax.random.uniform(keys[2], (1, output_size), jnp.float32, -k, k),
    }


# ------------------------------ Reference ---------------------------------- #

def text_rnn_reference(params, x, hidden, cell):
    L, B, H = hidden.shape
    inp = jnp.take(params["embed"], x, axis=0).astype(jnp.bfloat16)
    new_h, new_c = [], []
    for l in range(L):
        xh = jnp.concatenate([inp, hidden[l].astype(jnp.bfloat16)], axis=-1)
        gates = (jnp.dot(xh, params["w"][l], preferred_element_type=jnp.float32)
                 + params["b"][l])
        i = jax.nn.sigmoid(gates[:, 0 * H:1 * H])
        f = jax.nn.sigmoid(gates[:, 1 * H:2 * H])
        g = jnp.tanh(gates[:, 2 * H:3 * H])
        o = jax.nn.sigmoid(gates[:, 3 * H:4 * H])
        c_new = f * cell[l] + i * g
        h_new = o * jnp.tanh(c_new)
        new_h.append(h_new)
        new_c.append(c_new)
        inp = h_new.astype(jnp.bfloat16)
    logits = (jnp.dot(inp, params["fc_w"], preferred_element_type=jnp.float32)
              + params["fc_b"])
    return logits, (jnp.stack(new_h, 0), jnp.stack(new_c, 0))


if __name__ == "__main__":
    # Small but lane/sublane-friendly shapes (B multiple of 8, H/O multiple of 128).
    VOCAB = 128       # input_size
    HIDDEN = 128      # hidden_size
    LAYERS = 2        # num_layers
    OUT = 128         # output_size
    BATCH = 8

    key = jax.random.PRNGKey(0)
    pkey, xkey, hkey, ckey = jax.random.split(key, 4)
    params = init_params(pkey, VOCAB, HIDDEN, LAYERS, OUT)

    x = jax.random.randint(xkey, (BATCH,), 0, VOCAB, dtype=jnp.int32)
    # Module's init_hidden gives zeros; use small random states to exercise the
    # recurrent path as well (forward accepts arbitrary hidden/cell).
    hidden = 0.5 * jax.random.normal(hkey, (LAYERS, BATCH, HIDDEN), jnp.float32)
    cell = 0.5 * jax.random.normal(ckey, (LAYERS, BATCH, HIDDEN), jnp.float32)

    fwd = jax.jit(text_rnn_forward)
    logits, (h_new, c_new) = fwd(params, x, hidden, cell)
    jax.block_until_ready((logits, h_new, c_new))

    ref_logits, (ref_h, ref_c) = text_rnn_reference(params, x, hidden, cell)
    assert logits.shape == (BATCH, OUT)
    assert h_new.shape == (LAYERS, BATCH, HIDDEN)
    assert c_new.shape == (LAYERS, BATCH, HIDDEN)
    assert jnp.allclose(logits, ref_logits, atol=2e-3, rtol=2e-3)
    assert jnp.allclose(h_new, ref_h, atol=2e-3, rtol=2e-3)
    assert jnp.allclose(c_new, ref_c, atol=2e-3, rtol=2e-3)

    print("KERNEL_OK")
</pallas_src>

<mosaic_0001>
module attributes {stable_mosaic.version = 11 : i64} {
  func.func @text_rnn_kernel(%arg0: memref<8xi32, #tpu.memory_space<smem>>, %arg1: memref<128x128xf32, #tpu.memory_space<vmem>>, %arg2: memref<2x256x512xbf16, #tpu.memory_space<vmem>>, %arg3: memref<2x1x512xf32, #tpu.memory_space<vmem>>, %arg4: memref<128x128xbf16, #tpu.memory_space<vmem>>, %arg5: memref<1x128xf32, #tpu.memory_space<vmem>>, %arg6: memref<2x8x128xf32, #tpu.memory_space<vmem>>, %arg7: memref<2x8x128xf32, #tpu.memory_space<vmem>>, %arg8: memref<8x128xf32, #tpu.memory_space<vmem>>, %arg9: memref<2x8x128xf32, #tpu.memory_space<vmem>>, %arg10: memref<2x8x128xf32, #tpu.memory_space<vmem>>, %arg11: memref<8x256xbf16, #tpu.memory_space<vmem>>) attributes {dimension_semantics = [], scalar_prefetch = 0 : i64, scratch_operands = 1 : i64, tpu.core_type = #tpu.core_type<tc>} {
    %c0 = arith.constant 0 : index
    %0 = memref.load %arg0[%c0] : memref<8xi32, #tpu.memory_space<smem>>
    %1 = arith.index_cast %0 : i32 to index
    %c0_0 = arith.constant 0 : index
    %2 = vector.load %arg1[%1, %c0_0] : memref<128x128xf32, #tpu.memory_space<vmem>>, vector<1x128xf32>
    %3 = arith.truncf %2 : vector<1x128xf32> to vector<1x128xbf16>
    %c0_1 = arith.constant 0 : index
    %c0_2 = arith.constant 0 : index
    %4 = vector.load %arg11[%c0_1, %c0_2] : memref<8x256xbf16, #tpu.memory_space<vmem>>, vector<1x128xbf16>
    tpu.vector_store %arg11[%c0_1, %c0_2], %3 {strides = array<i32>} : memref<8x256xbf16, #tpu.memory_space<vmem>>, vector<1x128xbf16>,
    %c1 = arith.constant 1 : index
    %5 = memref.load %arg0[%c1] : memref<8xi32, #tpu.memory_space<smem>>
    %6 = arith.index_cast %5 : i32 to index
    %c0_3 = arith.constant 0 : index
    %7 = vector.load %arg1[%6, %c0_3] : memref<128x128xf32, #tpu.memory_space<vmem>>, vector<1x128xf32>
    %8 = arith.truncf %7 : vector<1x128xf32> to vector<1x128xbf16>
    %c1_4 = arith.constant 1 : index
    %c0_5 = arith.constant 0 : index
    %9 = vector.load %arg11[%c1_4, %c0_5] : memref<8x256xbf16, #tpu.memory_space<vmem>>, vector<1x128xbf16>
    tpu.vector_store %arg11[%c1_4, %c0_5], %8 {strides = array<i32>} : memref<8x256xbf16, #tpu.memory_space<vmem>>, vector<1x128xbf16>,
    %c2 = arith.constant 2 : index
    %10 = memref.load %arg0[%c2] : memref<8xi32, #tpu.memory_space<smem>>
    %11 = arith.index_cast %10 : i32 to index
    %c0_6 = arith.constant 0 : index
    %12 = vector.load %arg1[%11, %c0_6] : memref<128x128xf32, #tpu.memory_space<vmem>>, vector<1x128xf32>
    %13 = arith.truncf %12 : vector<1x128xf32> to vector<1x128xbf16>
    %c2_7 = arith.constant 2 : index
    %c0_8 = arith.constant 0 : index
    %14 = vector.load %arg11[%c2_7, %c0_8] : memref<8x256xbf16, #tpu.memory_space<vmem>>, vector<1x128xbf16>
    tpu.vector_store %arg11[%c2_7, %c0_8], %13 {strides = array<i32>} : memref<8x256xbf16, #tpu.memory_space<vmem>>, vector<1x128xbf16>,
    %c3 = arith.constant 3 : index
    %15 = memref.load %arg0[%c3] : memref<8xi32, #tpu.memory_space<smem>>
    %16 = arith.index_cast %15 : i32 to index
    %c0_9 = arith.constant 0 : index
    %17 = vector.load %arg1[%16, %c0_9] : memref<128x128xf32, #tpu.memory_space<vmem>>, vector<1x128xf32>
    %18 = arith.truncf %17 : vector<1x128xf32> to vector<1x128xbf16>
    %c3_10 = arith.constant 3 : index
    %c0_11 = arith.constant 0 : index
    %19 = vector.load %arg11[%c3_10, %c0_11] : memref<8x256xbf16, #tpu.memory_space<vmem>>, vector<1x128xbf16>
    tpu.vector_store %arg11[%c3_10, %c0_11], %18 {strides = array<i32>} : memref<8x256xbf16, #tpu.memory_space<vmem>>, vector<1x128xbf16>,
    %c4 = arith.constant 4 : index
    %20 = memref.load %arg0[%c4] : memref<8xi32, #tpu.memory_space<smem>>
    %21 = arith.index_cast %20 : i32 to index
    %c0_12 = arith.constant 0 : index
    %22 = vector.load %arg1[%21, %c0_12] : memref<128x128xf32, #tpu.memory_space<vmem>>, vector<1x128xf32>
    %23 = arith.truncf %22 : vector<1x128xf32> to vector<1x128xbf16>
    %c4_13 = arith.constant 4 : index
    %c0_14 = arith.constant 0 : index
    %24 = vector.load %arg11[%c4_13, %c0_14] : memref<8x256xbf16, #tpu.memory_space<vmem>>, vector<1x128xbf16>
    tpu.vector_store %arg11[%c4_13, %c0_14], %23 {strides = array<i32>} : memref<8x256xbf16, #tpu.memory_space<vmem>>, vector<1x128xbf16>,
    %c5 = arith.constant 5 : index
    %25 = memref.load %arg0[%c5] : memref<8xi32, #tpu.memory_space<smem>>
    %26 = arith.index_cast %25 : i32 to index
    %c0_15 = arith.constant 0 : index
    %27 = vector.load %arg1[%26, %c0_15] : memref<128x128xf32, #tpu.memory_space<vmem>>, vector<1x128xf32>
    %28 = arith.truncf %27 : vector<1x128xf32> to vector<1x128xbf16>
    %c5_16 = arith.constant 5 : index
    %c0_17 = arith.constant 0 : index
    %29 = vector.load %arg11[%c5_16, %c0_17] : memref<8x256xbf16, #tpu.memory_space<vmem>>, vector<1x128xbf16>
    tpu.vector_store %arg11[%c5_16, %c0_17], %28 {strides = array<i32>} : memref<8x256xbf16, #tpu.memory_space<vmem>>, vector<1x128xbf16>,
    %c6 = arith.constant 6 : index
    %30 = memref.load %arg0[%c6] : memref<8xi32, #tpu.memory_space<smem>>
    %31 = arith.index_cast %30 : i32 to index
    %c0_18 = arith.constant 0 : index
    %32 = vector.load %arg1[%31, %c0_18] : memref<128x128xf32, #tpu.memory_space<vmem>>, vector<1x128xf32>
    %33 = arith.truncf %32 : vector<1x128xf32> to vector<1x128xbf16>
    %c6_19 = arith.constant 6 : index
    %c0_20 = arith.constant 0 : index
    %34 = vector.load %arg11[%c6_19, %c0_20] : memref<8x256xbf16, #tpu.memory_space<vmem>>, vector<1x128xbf16>
    tpu.vector_store %arg11[%c6_19, %c0_20], %33 {strides = array<i32>} : memref<8x256xbf16, #tpu.memory_space<vmem>>, vector<1x128xbf16>,
    %c7 = arith.constant 7 : index
    %35 = memref.load %arg0[%c7] : memref<8xi32, #tpu.memory_space<smem>>
    %36 = arith.index_cast %35 : i32 to index
    %c0_21 = arith.constant 0 : index
    %37 = vector.load %arg1[%36, %c0_21] : memref<128x128xf32, #tpu.memory_space<vmem>>, vector<1x128xf32>
    %38 = arith.truncf %37 : vector<1x128xf32> to vector<1x128xbf16>
    %c7_22 = arith.constant 7 : index
    %c0_23 = arith.constant 0 : index
    %39 = vector.load %arg11[%c7_22, %c0_23] : memref<8x256xbf16, #tpu.memory_space<vmem>>, vector<1x128xbf16>
    tpu.vector_store %arg11[%c7_22, %c0_23], %38 {strides = array<i32>} : memref<8x256xbf16, #tpu.memory_space<vmem>>, vector<1x128xbf16>,
    %c0_24 = arith.constant 0 : index
    %c0_25 = arith.constant 0 : index
    %c0_26 = arith.constant 0 : index
    %40 = vector.load %arg6[%c0_24, %c0_25, %c0_26] : memref<2x8x128xf32, #tpu.memory_space<vmem>>, vector<1x8x128xf32>
    %41 = vector.shape_cast %40 : vector<1x8x128xf32> to vector<8x128xf32>
    %42 = arith.truncf %41 : vector<8x128xf32> to vector<8x128xbf16>
    %c0_27 = arith.constant 0 : index
    %c128 = arith.constant 128 : index
    %43 = vector.load %arg11[%c0_27, %c128] : memref<8x256xbf16, #tpu.memory_space<vmem>>, vector<8x128xbf16>
    tpu.vector_store %arg11[%c0_27, %c128], %42 {strides = array<i32>} : memref<8x256xbf16, #tpu.memory_space<vmem>>, vector<8x128xbf16>,
    %c0_28 = arith.constant 0 : index
    %c0_29 = arith.constant 0 : index
    %44 = vector.load %arg11[%c0_28, %c0_29] : memref<8x256xbf16, #tpu.memory_space<vmem>>, vector<8x256xbf16>
    %c0_30 = arith.constant 0 : index
    %c0_31 = arith.constant 0 : index
    %c0_32 = arith.constant 0 : index
    %45 = vector.load %arg2[%c0_30, %c0_31, %c0_32] : memref<2x256x512xbf16, #tpu.memory_space<vmem>>, vector<1x256x512xbf16>
    %46 = vector.shape_cast %45 : vector<1x256x512xbf16> to vector<256x512xbf16>
    %cst = arith.constant dense<0.000000e+00> : vector<8x512xf32>
    %47 = tpu.matmul %44, %46, %cst {dimension_numbers = #tpu.dot_dimension_numbers<[1], [0], [0], [1], [0, 0, 1, 1], [], []>} : vector<8x256xbf16>, vector<256x512xbf16>, vector<8x512xf32> -> vector<8x512xf32>
    %c0_33 = arith.constant 0 : index
    %c0_34 = arith.constant 0 : index
    %c0_35 = arith.constant 0 : index
    %48 = vector.load %arg3[%c0_33, %c0_34, %c0_35] : memref<2x1x512xf32, #tpu.memory_space<vmem>>, vector<1x1x512xf32>
    %49 = vector.shape_cast %48 : vector<1x1x512xf32> to vector<1x512xf32>
    %50 = vector.broadcast %49 : vector<1x512xf32> to vector<8x512xf32>
    %51 = arith.addf %47, %50 : vector<8x512xf32>
    %52 = vector.extract_strided_slice %51 {offsets = [0, 0], sizes = [8, 128], strides = [1, 1]} : vector<8x512xf32> to vector<8x128xf32>
    %53 = arith.negf %52 : vector<8x128xf32>
    %54 = math.exp %53 : vector<8x128xf32>
    %cst_36 = arith.constant 1.000000e+00 : f32
    %55 = vector.broadcast %cst_36 : f32 to vector<8x128xf32>
    %56 = arith.addf %55, %54 : vector<8x128xf32>
    %57 = arith.divf %55, %56 : vector<8x128xf32>
    %58 = vector.extract_strided_slice %51 {offsets = [0, 128], sizes = [8, 128], strides = [1, 1]} : vector<8x512xf32> to vector<8x128xf32>
    %59 = arith.negf %58 : vector<8x128xf32>
    %60 = math.exp %59 : vector<8x128xf32>
    %cst_37 = arith.constant 1.000000e+00 : f32
    %61 = vector.broadcast %cst_37 : f32 to vector<8x128xf32>
    %62 = arith.addf %61, %60 : vector<8x128xf32>
    %63 = arith.divf %61, %62 : vector<8x128xf32>
    %64 = vector.extract_strided_slice %51 {offsets = [0, 256], sizes = [8, 128], strides = [1, 1]} : vector<8x512xf32> to vector<8x128xf32>
    %65 = math.tanh %64 : vector<8x128xf32>
    %66 = vector.extract_strided_slice %51 {offsets = [0, 384], sizes = [8, 128], strides = [1, 1]} : vector<8x512xf32> to vector<8x128xf32>
    %67 = arith.negf %66 : vector<8x128xf32>
    %68 = math.exp %67 : vector<8x128xf32>
    %cst_38 = arith.constant 1.000000e+00 : f32
    %69 = vector.broadcast %cst_38 : f32 to vector<8x128xf32>
    %70 = arith.addf %69, %68 : vector<8x128xf32>
    %71 = arith.divf %69, %70 : vector<8x128xf32>
    %c0_39 = arith.constant 0 : index
    %c0_40 = arith.constant 0 : index
    %c0_41 = arith.constant 0 : index
    %72 = vector.load %arg7[%c0_39, %c0_40, %c0_41] : memref<2x8x128xf32, #tpu.memory_space<vmem>>, vector<1x8x128xf32>
    %73 = vector.shape_cast %72 : vector<1x8x128xf32> to vector<8x128xf32>
    %74 = arith.mulf %63, %73 : vector<8x128xf32>
    %75 = arith.mulf %57, %65 : vector<8x128xf32>
    %76 = arith.addf %74, %75 : vector<8x128xf32>
    %77 = math.tanh %76 : vector<8x128xf32>
    %78 = arith.mulf %71, %77 : vector<8x128xf32>
    %c0_42 = arith.constant 0 : index
    %c0_43 = arith.constant 0 : index
    %c0_44 = arith.constant 0 : index
    %79 = vector.load %arg9[%c0_42, %c0_43, %c0_44] : memref<2x8x128xf32, #tpu.memory_space<vmem>>, vector<1x8x128xf32>
    %80 = vector.shape_cast %79 : vector<1x8x128xf32> to vector<8x128xf32>
    %81 = vector.shape_cast %78 : vector<8x128xf32> to vector<1x8x128xf32>
    tpu.vector_store %arg9[%c0_42, %c0_43, %c0_44], %81 {strides = array<i32>} : memref<2x8x128xf32, #tpu.memory_space<vmem>>, vector<1x8x128xf32>,
    %c0_45 = arith.constant 0 : index
    %c0_46 = arith.constant 0 : index
    %c0_47 = arith.constant 0 : index
    %82 = vector.load %arg10[%c0_45, %c0_46, %c0_47] : memref<2x8x128xf32, #tpu.memory_space<vmem>>, vector<1x8x128xf32>
    %83 = vector.shape_cast %82 : vector<1x8x128xf32> to vector<8x128xf32>
    %84 = vector.shape_cast %76 : vector<8x128xf32> to vector<1x8x128xf32>
    tpu.vector_store %arg10[%c0_45, %c0_46, %c0_47], %84 {strides = array<i32>} : memref<2x8x128xf32, #tpu.memory_space<vmem>>, vector<1x8x128xf32>,
    %85 = arith.truncf %78 : vector<8x128xf32> to vector<8x128xbf16>
    %c0_48 = arith.constant 0 : index
    %c0_49 = arith.constant 0 : index
    %86 = vector.load %arg11[%c0_48, %c0_49] : memref<8x256xbf16, #tpu.memory_space<vmem>>, vector<8x128xbf16>
    tpu.vector_store %arg11[%c0_48, %c0_49], %85 {strides = array<i32>} : memref<8x256xbf16, #tpu.memory_space<vmem>>, vector<8x128xbf16>,
    %c1_50 = arith.constant 1 : index
    %c0_51 = arith.constant 0 : index
    %c0_52 = arith.constant 0 : index
    %87 = vector.load %arg6[%c1_50, %c0_51, %c0_52] : memref<2x8x128xf32, #tpu.memory_space<vmem>>, vector<1x8x128xf32>
    %88 = vector.shape_cast %87 : vector<1x8x128xf32> to vector<8x128xf32>
    %89 = arith.truncf %88 : vector<8x128xf32> to vector<8x128xbf16>
    %c0_53 = arith.constant 0 : index
    %c128_54 = arith.constant 128 : index
    %90 = vector.load %arg11[%c0_53, %c128_54] : memref<8x256xbf16, #tpu.memory_space<vmem>>, vector<8x128xbf16>
    tpu.vector_store %arg11[%c0_53, %c128_54], %89 {strides = array<i32>} : memref<8x256xbf16, #tpu.memory_space<vmem>>, vector<8x128xbf16>,
    %c0_55 = arith.constant 0 : index
    %c0_56 = arith.constant 0 : index
    %91 = vector.load %arg11[%c0_55, %c0_56] : memref<8x256xbf16, #tpu.memory_space<vmem>>, vector<8x256xbf16>
    %c1_57 = arith.constant 1 : index
    %c0_58 = arith.constant 0 : index
    %c0_59 = arith.constant 0 : index
    %92 = vector.load %arg2[%c1_57, %c0_58, %c0_59] : memref<2x256x512xbf16, #tpu.memory_space<vmem>>, vector<1x256x512xbf16>
    %93 = vector.shape_cast %92 : vector<1x256x512xbf16> to vector<256x512xbf16>
    %cst_60 = arith.constant dense<0.000000e+00> : vector<8x512xf32>
    %94 = tpu.matmul %91, %93, %cst_60 {dimension_numbers = #tpu.dot_dimension_numbers<[1], [0], [0], [1], [0, 0, 1, 1], [], []>} : vector<8x256xbf16>, vector<256x512xbf16>, vector<8x512xf32> -> vector<8x512xf32>
    %c1_61 = arith.constant 1 : index
    %c0_62 = arith.constant 0 : index
    %c0_63 = arith.constant 0 : index
    %95 = vector.load %arg3[%c1_61, %c0_62, %c0_63] : memref<2x1x512xf32, #tpu.memory_space<vmem>>, vector<1x1x512xf32>
    %96 = vector.shape_cast %95 : vector<1x1x512xf32> to vector<1x512xf32>
    %97 = vector.broadcast %96 : vector<1x512xf32> to vector<8x512xf32>
    %98 = arith.addf %94, %97 : vector<8x512xf32>
    %99 = vector.extract_strided_slice %98 {offsets = [0, 0], sizes = [8, 128], strides = [1, 1]} : vector<8x512xf32> to vector<8x128xf32>
    %100 = arith.negf %99 : vector<8x128xf32>
    %101 = math.exp %100 : vector<8x128xf32>
    %cst_64 = arith.constant 1.000000e+00 : f32
    %102 = vector.broadcast %cst_64 : f32 to vector<8x128xf32>
    %103 = arith.addf %102, %101 : vector<8x128xf32>
    %104 = arith.divf %102, %103 : vector<8x128xf32>
    %105 = vector.extract_strided_slice %98 {offsets = [0, 128], sizes = [8, 128], strides = [1, 1]} : vector<8x512xf32> to vector<8x128xf32>
    %106 = arith.negf %105 : vector<8x128xf32>
    %107 = math.exp %106 : vector<8x128xf32>
    %cst_65 = arith.constant 1.000000e+00 : f32
    %108 = vector.broadcast %cst_65 : f32 to vector<8x128xf32>
    %109 = arith.addf %108, %107 : vector<8x128xf32>
    %110 = arith.divf %108, %109 : vector<8x128xf32>
    %111 = vector.extract_strided_slice %98 {offsets = [0, 256], sizes = [8, 128], strides = [1, 1]} : vector<8x512xf32> to vector<8x128xf32>
    %112 = math.tanh %111 : vector<8x128xf32>
    %113 = vector.extract_strided_slice %98 {offsets = [0, 384], sizes = [8, 128], strides = [1, 1]} : vector<8x512xf32> to vector<8x128xf32>
    %114 = arith.negf %113 : vector<8x128xf32>
    %115 = math.exp %114 : vector<8x128xf32>
    %cst_66 = arith.constant 1.000000e+00 : f32
    %116 = vector.broadcast %cst_66 : f32 to vector<8x128xf32>
    %117 = arith.addf %116, %115 : vector<8x128xf32>
    %118 = arith.divf %116, %117 : vector<8x128xf32>
    %c1_67 = arith.constant 1 : index
    %c0_68 = arith.constant 0 : index
    %c0_69 = arith.constant 0 : index
    %119 = vector.load %arg7[%c1_67, %c0_68, %c0_69] : memref<2x8x128xf32, #tpu.memory_space<vmem>>, vector<1x8x128xf32>
    %120 = vector.shape_cast %119 : vector<1x8x128xf32> to vector<8x128xf32>
    %121 = arith.mulf %110, %120 : vector<8x128xf32>
    %122 = arith.mulf %104, %112 : vector<8x128xf32>
    %123 = arith.addf %121, %122 : vector<8x128xf32>
    %124 = math.tanh %123 : vector<8x128xf32>
    %125 = arith.mulf %118, %124 : vector<8x128xf32>
    %c1_70 = arith.constant 1 : index
    %c0_71 = arith.constant 0 : index
    %c0_72 = arith.constant 0 : index
    %126 = vector.load %arg9[%c1_70, %c0_71, %c0_72] : memref<2x8x128xf32, #tpu.memory_space<vmem>>, vector<1x8x128xf32>
    %127 = vector.shape_cast %126 : vector<1x8x128xf32> to vector<8x128xf32>
    %128 = vector.shape_cast %125 : vector<8x128xf32> to vector<1x8x128xf32>
    tpu.vector_store %arg9[%c1_70, %c0_71, %c0_72], %128 {strides = array<i32>} : memref<2x8x128xf32, #tpu.memory_space<vmem>>, vector<1x8x128xf32>,
    %c1_73 = arith.constant 1 : index
    %c0_74 = arith.constant 0 : index
    %c0_75 = arith.constant 0 : index
    %129 = vector.load %arg10[%c1_73, %c0_74, %c0_75] : memref<2x8x128xf32, #tpu.memory_space<vmem>>, vector<1x8x128xf32>
    %130 = vector.shape_cast %129 : vector<1x8x128xf32> to vector<8x128xf32>
    %131 = vector.shape_cast %123 : vector<8x128xf32> to vector<1x8x128xf32>
    tpu.vector_store %arg10[%c1_73, %c0_74, %c0_75], %131 {strides = array<i32>} : memref<2x8x128xf32, #tpu.memory_space<vmem>>, vector<1x8x128xf32>,
    %132 = arith.truncf %125 : vector<8x128xf32> to vector<8x128xbf16>
    %c0_76 = arith.constant 0 : index
    %c0_77 = arith.constant 0 : index
    %133 = vector.load %arg4[%c0_76, %c0_77] : memref<128x128xbf16, #tpu.memory_space<vmem>>, vector<128x128xbf16>
    %cst_78 = arith.constant dense<0.000000e+00> : vector<8x128xf32>
    %134 = tpu.matmul %132, %133, %cst_78 {dimension_numbers = #tpu.dot_dimension_numbers<[1], [0], [0], [1], [0, 0, 1, 1], [], []>} : vector<8x128xbf16>, vector<128x128xbf16>, vector<8x128xf32> -> vector<8x128xf32>
    %c0_79 = arith.constant 0 : index
    %c0_80 = arith.constant 0 : index
    %135 = vector.load %arg5[%c0_79, %c0_80] : memref<1x128xf32, #tpu.memory_space<vmem>>, vector<1x128xf32>
    %136 = vector.broadcast %135 : vector<1x128xf32> to vector<8x128xf32>
    %137 = arith.addf %134, %136 : vector<8x128xf32>
    %c0_81 = arith.constant 0 : index
    %c0_82 = arith.constant 0 : index
    %138 = vector.load %arg8[%c0_81, %c0_82] : memref<8x128xf32, #tpu.memory_space<vmem>>, vector<8x128xf32>
    tpu.vector_store %arg8[%c0_81, %c0_82], %137 {strides = array<i32>} : memref<8x128xf32, #tpu.memory_space<vmem>>, vector<8x128xf32>,
    return
  }
}

</mosaic_0001>

<bundles_post_ra>
// kernel: text_rnn_forward.1
= control target key start
LH: loop header
LB: loop body
LE: loop exit
PB: predicated region body
PF: predicated region fallthrough
CT: control target
= control target key end

     0   :  { %16 = vsyncpa [#allocation6], 0  ;;  %s2350_s0 = inlined_call_operand.vmem [shape: s32[8], index: 0, kind: input, shape index: {}]   ;;  %s2351_s1 = inlined_call_operand.hbm [shape: f32[128,128], index: 1, kind: input, shape index: {}]   ;;  %s2352_s2 = inlined_call_operand.hbm [shape: bf16[2,256,512], index: 2, kind: input, shape index: {}]   ;;  %s2353_s3 = inlined_call_operand.vmem [shape: f32[2,1,512], index: 3, kind: input, shape index: {}]   ;;  %s2354_s4 = inlined_call_operand.vmem [shape: bf16[128,128], index: 4, kind: input, shape index: {}]   ;;  %s2355_s5 = inlined_call_operand.hbm [shape: f32[1,128], index: 5, kind: input, shape index: {}]   ;;  %s2356_s6 = inlined_call_operand.hbm [shape: f32[2,8,128], index: 6, kind: input, shape index: {}, may-alias: {6,9}]   ;;  %s2357_s7 = inlined_call_operand.hbm [shape: f32[2,8,128], index: 7, kind: input, shape index: {}, may-alias: {7,10}]   ;;  %s2358_s8 = inlined_call_operand.hbm [shape: f32[8,128], index: 8, kind: output, shape index: {0}]   ;;  %s2359_s9 = inlined_call_operand.hbm [shape: f32[2,8,128], index: 9, kind: output, shape index: {1}, may-alias: {6,9}]   ;;  %s2360_s10 = inlined_call_operand.hbm [shape: f32[2,8,128], index: 10, kind: output, shape index: {2}, may-alias: {7,10}]  }
   0x1   :  { %17 = vsyncpa [#allocation4], 0 }
   0x2   :  { %18 = vsyncpa [#allocation9], 0 }
   0x3   :  { %19 = vsyncpa [#allocation12], 0 }
   0x4   :  { %20 = vsyncpa [#allocation5], 0 }
   0x5   :  { %21 = vsyncpa [#allocation16], 0  ;;  %s2104_s13 = smov [#allocation8]  }
   0x6   :  { %s49_s14 = sshll.u32 %s2104_s13, 4  ;;  %s50_s14 = int_to_ptr.vmem [resolvable:$true] %s49_s14 }
   0x7   :  { %s1928_s15 = scalar_lea.vmem %s50_s14, 16384  ;;  %p1933_p1 = scmp.lt.s32.totalorder %s50_s14, %s50_s14 }
   0x8   :  { %p1929_p0 = scmp.ne.s32.totalorder %s50_s14, %s1928_s15  ;;  %p1934_p2 = scmp.lt.s32.totalorder %s1928_s15, %s1928_s15 }
   0xa   :  { %p1935_p3 = por %p1934_p2, %p1933_p1 }
   0xc   :  { %p1936_p4 = pnand %p1935_p3, %p1929_p0 }
   0xe   :  { %1939 = shalt.err (!%p1936_p4)
}
   0xf   :  { %s2105_s16 = smov 256   ;;  %s2106_s17 = smov 16  }
  0x10   :  { %55 = dma.hbm_to_vmem [thread:$0]  %s2352_s2, 16384, %s50_s14, [#allocation9], %s2105_s16, %s2105_s16, %s2106_s17  }
  0x11   :  { %s2107_s20 = smov [#allocation11]   ;;  %s28_s24 = sshll.u32 %s2350_s0, 4  ;;  %s29_s24 = int_to_ptr.vmem [resolvable:$true] %s28_s24 }
  0x12   :  { %s75_s21 = sshll.u32 %s2107_s20, 4  ;;  %s76_s21 = int_to_ptr.vmem [resolvable:$true] %s75_s21 }
  0x13   :  { %s1948_s25 = scalar_lea.vmem %s76_s21, 256  ;;  %p1953_p6 = scmp.lt.s32.totalorder %s76_s21, %s76_s21 }
  0x14   :  { %p1949_p5 = scmp.ne.s32.totalorder %s76_s21, %s1948_s25  ;;  %p1954_p7 = scmp.lt.s32.totalorder %s1948_s25, %s1948_s25 }
  0x16   :  { %p1955_p8 = por %p1954_p7, %p1953_p6 }
  0x18   :  { %p1956_p9 = pnand %p1955_p8, %p1949_p5 }
  0x1a   :  { %1959 = shalt.err (!%p1956_p9)
}
  0x1b   :  { %s2108_s26 = smov 128   ;;  %s2109_s27 = smov 8  }
  0x1c   :  { %81 = dma.hbm_to_vmem [thread:$0]  %s2356_s6, 256, %s76_s21, [#allocation12], %s2108_s26, %s2108_s26, %s2109_s27  }
  0x1d   :  { %s1960_s29 = scalar_lea.vmem %s29_s24, 16  ;;  %p1965_p11 = scmp.lt.s32.totalorder %s29_s24, %s29_s24 }
  0x1e   :  { %p1961_p10 = scmp.ne.s32.totalorder %s29_s24, %s1960_s29  ;;  %p1966_p12 = scmp.lt.s32.totalorder %s1960_s29, %s1960_s29 }
  0x20   :  { %p1967_p13 = por %p1966_p12, %p1965_p11 }
  0x22   :  { %p1968_p0 = pnand %p1967_p13, %p1961_p10 }
  0x24   :  { %1971 = shalt.err (!%p1968_p0)
}
  0x25   :  { %s2110_s0 = smov [#allocation3]   ;;  %s2111_s30 = smov [#allocation7]  }
  0x26   :  { %31 = dma.vmem_to_smem %s29_s24, 16, %s2110_s0, [#allocation6]  }
  0x27   :  { %s37_s11 = sshll.u32 %s2111_s30, 4  ;;  %s2112_s12 = smov [#allocation10]   ;;  %s38_s11 = int_to_ptr.vmem [resolvable:$true] %s37_s11 }
  0x28   :  { %s66_s13 = sshll.u32 %s2112_s12, 4  ;;  %s1980_s14 = scalar_lea.vmem %s38_s11, 2048  ;;  %s67_s13 = int_to_ptr.vmem [resolvable:$true] %s66_s13 }
  0x29   :  { %p1981_p1 = scmp.ne.s32.totalorder %s38_s11, %s1980_s14  ;;  %p1985_p2 = scmp.lt.s32.totalorder %s38_s11, %s38_s11 }
  0x2a   :  { %p1986_p3 = scmp.lt.s32.totalorder %s1980_s14, %s1980_s14 }
  0x2c   :  { %p1987_p4 = por %p1986_p3, %p1985_p2 }
  0x2e   :  { %p1988_p5 = pnand %p1987_p4, %p1981_p1 }
  0x30   :  { %1991 = shalt.err (!%p1988_p5)
}
  0x31   :  { %43 = dma.hbm_to_vmem [thread:$0]  %s2351_s1, 2048, %s38_s11, [#allocation4], %s2108_s26, %s2108_s26, %s2109_s27  }
  0x32   :  { %s2000_s16 = scalar_lea.vmem %s67_s13, 16  ;;  %s2004_s17 = scalar_lea.vmem %s67_s13, 32 }
  0x33   :  { %p2001_p6 = scmp.ne.s32.totalorder %s67_s13, %s2000_s16  ;;  %p2005_p7 = scmp.lt.s32.totalorder %s67_s13, %s67_s13 }
  0x34   :  { %p2006_p8 = scmp.lt.s32.totalorder %s2004_s17, %s2000_s16 }
  0x36   :  { %p2007_p9 = por %p2006_p8, %p2005_p7 }
  0x38   :  { %p2008_p10 = pnand %p2007_p9, %p2001_p6 }
  0x3a   :  { %2011 = shalt.err (!%p2008_p10)
}
  0x3b   :  { %69 = dma.hbm_to_vmem [thread:$0]  %s2355_s5, 16, %s67_s13, [#allocation9]  }
  0x3c   :  { %s2113_s20 = smov [#allocation13]  }
  0x3d   :  { %s87_s21 = sshll.u32 %s2113_s20, 4  ;;  %s88_s21 = int_to_ptr.vmem [resolvable:$true] %s87_s21 }
  0x3e   :  { %s2020_s22 = scalar_lea.vmem %s88_s21, 256  ;;  %p2025_p12 = scmp.lt.s32.totalorder %s88_s21, %s88_s21 }
  0x3f   :  { %p2021_p11 = scmp.ne.s32.totalorder %s88_s21, %s2020_s22  ;;  %p2026_p13 = scmp.lt.s32.totalorder %s2020_s22, %s2020_s22 }
  0x41   :  { %p2027_p0 = por %p2026_p13, %p2025_p12 }
  0x43   :  { %p2028_p1 = pnand %p2027_p0, %p2021_p11 }
  0x45   :  { %2031 = shalt.err (!%p2028_p1)
}
  0x46   :  { %93 = dma.hbm_to_vmem [thread:$0]  %s2357_s7, 256, %s88_s21, [#allocation12], %s2108_s26, %s2108_s26, %s2109_s27  }
  0x47   :  { %2092 = dma.done.wait [#allocation6], 16  }
  0x48   :  { %2093 = vsyncadd [#allocation6], 4294967280 }
  0x49   :  { %2094 = dma.done.wait [#allocation4], 2048  }
  0x4a   :  { %2095 = vsyncadd [#allocation4], 4294965248 }
  0x4b   :  { %2096 = dma.done.wait [#allocation9], 16400  }
  0x4c   :  { %2097 = vsyncadd [#allocation9], 4294950896 }
  0x4d   :  { %2098 = dma.done.wait [#allocation12], 512  }
  0x4e   :  { %2099 = vsyncadd [#allocation12], 4294966784 }
  0x4f   :  { %112 = sfence }
  0x50   :  { %v1684_v0 = vld [vmem:[#allocation8 + $0xe4] ss:$16 sps:$4 sm:$0xff]   ;;  %v1686_v1 = vld [vmem:[#allocation8 + $0xe0] ss:$16 sps:$4 sm:$0xff]   ;;  %v1695_v5 = vld [vmem:[#allocation8 + $0xec] ss:$16 sps:$4 sm:$0xff]  }
  0x51   :  { %653 = vmatprep.subr.bf16.mxu0 %v1684_v0  ;;  %v1687_v2 = vld [vmem:[#allocation8 + $0xc4] ss:$16 sps:$4 sm:$0xff]   ;;  %v1689_v3 = vld [vmem:[#allocation8 + $0xc0] ss:$16 sps:$4 sm:$0xff]   ;;  %v1698_v6 = vld [vmem:[#allocation8 + $0xe8] ss:$16 sps:$4 sm:$0xff]   ;;  %694 = vmatprep.subr.bf16.mxu1 %v1695_v5 }
  0x52   :  { %654 = vmatpush1.bf16.msra.mxu0 %v1686_v1  ;;  %v1690_v4 = vld [vmem:[#allocation8 + $0xa4] ss:$16 sps:$4 sm:$0xff]   ;;  %v1692_v7 = vld [vmem:[#allocation8 + $0xa0] ss:$16 sps:$4 sm:$0xff]   ;;  %695 = vmatpush1.bf16.msra.mxu1 %v1698_v6  ;;  %v1701_v9 = vld [vmem:[#allocation8 + $0xcc] ss:$16 sps:$4 sm:$0xff]  }
  0x53   :  { %655 = vmatprep.subr.bf16.mxu0 %v1687_v2  ;;  %v1693_v8 = vld [vmem:[#allocation8 + $0x84] ss:$16 sps:$4 sm:$0xff]   ;;  %v1704_v10 = vld [vmem:[#allocation8 + $0xc8] ss:$16 sps:$4 sm:$0xff]   ;;  %696 = vmatprep.subr.bf16.mxu1 %v1701_v9  ;;  %v1697_v11 = vld [vmem:[#allocation8 + $0x80] ss:$16 sps:$4 sm:$0xff]  }
  0x54   :  { %v1699_v12 = vld [vmem:[#allocation8 + $0x64] ss:$16 sps:$4 sm:$0xff]   ;;  %v1707_v13 = vld [vmem:[#allocation8 + $0xac] ss:$16 sps:$4 sm:$0xff]   ;;  %v1710_v14 = vld [vmem:[#allocation8 + $0xa8] ss:$16 sps:$4 sm:$0xff]  }
  0x55   :  { %v1713_v15 = vld [vmem:[#allocation8 + $0x8c] ss:$16 sps:$4 sm:$0xff]   ;;  %v1703_v16 = vld [vmem:[#allocation8 + $0x60] ss:$16 sps:$4 sm:$0xff]   ;;  %v1705_v17 = vld [vmem:[#allocation8 + $0x44] ss:$16 sps:$4 sm:$0xff]  }
  0x56   :  { %656 = vmatpush1.bf16.msra.mxu0 %v1689_v3  ;;  %697 = vmatpush1.bf16.msra.mxu1 %v1704_v10  ;;  %v1716_v18 = vld [vmem:[#allocation8 + $0x88] ss:$16 sps:$4 sm:$0xff]   ;;  %v1719_v19 = vld [vmem:[#allocation8 + $0x6c] ss:$16 sps:$4 sm:$0xff]   ;;  %v1709_v20 = vld [vmem:[#allocation8 + $0x40] ss:$16 sps:$4 sm:$0xff]  }
  0x57   :  { %657 = vmatprep.subr.bf16.mxu0 %v1690_v4  ;;  %698 = vmatprep.subr.bf16.mxu1 %v1707_v13  ;;  %v1711_v21 = vld [vmem:[#allocation8 + $0x24] ss:$16 sps:$4 sm:$0xff]   ;;  %v1722_v22 = vld [vmem:[#allocation8 + $0x68] ss:$16 sps:$4 sm:$0xff]   ;;  %v1725_v23 = vld [vmem:[#allocation8 + $0x4c] ss:$16 sps:$4 sm:$0xff]  }
  0x58   :  { %v1715_v24 = vld [vmem:[#allocation8 + $0x20] ss:$16 sps:$4 sm:$0xff]   ;;  %v1717_v25 = vld [vmem:[#allocation8 + $0x4] ss:$16 sps:$4 sm:$0xff]   ;;  %v1728_v26 = vld [vmem:[#allocation8 + $0x48] ss:$16 sps:$4 sm:$0xff]  }
  0x59   :  { %v1731_v27 = vld [vmem:[#allocation8 + $0x2c] ss:$16 sps:$4 sm:$0xff]   ;;  %s2201_s5 = sld [smem:[#allocation3]]  ;;  %v1721_v28 = vld [vmem:[#allocation8] ss:$16 sps:$4 sm:$0xff]   ;;  %vm118_vm1 = vcmask 1040384  }
  0x5a   :  { %658 = vmatpush1.bf16.msra.mxu0 %v1692_v7  ;;  %699 = vmatpush1.bf16.msra.mxu1 %v1710_v14  ;;  %s2203_s7 = sld [smem:[#allocation3 + $0x1]]  ;;  %v1723_v29 = vld [vmem:[#allocation8 + $0x1e4] ss:$16 sps:$4 sm:$0xff]   ;;  %v1734_v30 = vld [vmem:[#allocation8 + $0x28] ss:$16 sps:$4 sm:$0xff]   ;;  %vm149_vm7 = vcmask 1041409  }
  0x5b   :  { %659 = vmatprep.subr.bf16.mxu0 %v1693_v8  ;;  %700 = vmatprep.subr.bf16.mxu1 %v1713_v15  ;;  %s2205_s24 = sld [smem:[#allocation3 + $0x2]]  ;;  %v1737_v31 = vld [vmem:[#allocation8 + $0xc] ss:$16 sps:$4 sm:$0xff]   ;;  %v1727_v32 = vld [vmem:[#allocation8 + $0x1e0] ss:$16 sps:$4 sm:$0xff]   ;;  %vm181_vm8 = vcmask 1042434  }
  0x5c   :  { %s2207_s25 = sld [smem:[#allocation3 + $0x3]]  ;;  %vm119_vm0 = vsmask.f32 256  ;;  %v1729_v33 = vld [vmem:[#allocation8 + $0x1c4] ss:$16 sps:$4 sm:$0xff]   ;;  %vm213_vm9 = vcmask 1043459  }
  0x5d   :  { %s2209_s2 = sld [smem:[#allocation3 + $0x4]]  ;;  %v1740_v34 = vld [vmem:[#allocation8 + $0x8] ss:$16 sps:$4 sm:$0xff]   ;;  %v1743_v35 = vld [vmem:[#allocation8 + $0x1ec] ss:$16 sps:$4 sm:$0xff]   ;;  %vm120_vm6 = vmand %vm118_vm1, %vm119_vm0 }
  0x5e   :  { %660 = vmatpush1.bf16.msra.mxu0 %v1697_v11  ;;  %701 = vmatpush1.bf16.msra.mxu1 %v1716_v18  ;;  %s2211_s28 = sld [smem:[#allocation3 + $0x5]]  ;;  %vm150_vm2 = vsmask.f32 1280  ;;  %v1733_v36 = vld [vmem:[#allocation8 + $0x1c0] ss:$16 sps:$4 sm:$0xff]  }
  0x5f   :  { %661 = vmatprep.subr.bf16.mxu0 %v1699_v12  ;;  %702 = vmatprep.subr.bf16.mxu1 %v1719_v19  ;;  %s2213_s29 = sld [smem:[#allocation3 + $0x6]]  ;;  %v1735_v37 = vld [vmem:[#allocation8 + $0x1a4] ss:$16 sps:$4 sm:$0xff]   ;;  %v1746_v38 = vld [vmem:[#allocation8 + $0x1e8] ss:$16 sps:$4 sm:$0xff]   ;;  %s115_s30 = scalar_lea.vmem [#allocation7], %s2201_s5  ;;  %vm2226_vm10 = vmand %vm149_vm7, %vm150_vm2 }
  0x60   :  { %s2215_s0 = sld [smem:[#allocation3 + $0x7]]  ;;  %vm135_vm3 = vsmask.f32 7938  ;;  %vm182_vm4 = vsmask.f32 2304  ;;  %s125_s11 = scalar_lea.vmem [#allocation7], %s2203_s7 }
  0x61   :  { %v1739_v39 = vld [vmem:[#allocation8 + $0x1a0] ss:$16 sps:$4 sm:$0xff]   ;;  %v1749_v40 = vld [vmem:[#allocation8 + $0x1cc] ss:$16 sps:$4 sm:$0xff]   ;;  %vm167_vm5 = vsmask.f32 7942  ;;  %vm2233_vm12 = vmand %vm181_vm8, %vm182_vm4 }
  0x62   :  { %662 = vmatpush1.bf16.msra.mxu0 %v1703_v16  ;;  %703 = vmatpush1.bf16.msra.mxu1 %v1722_v22  ;;  %v1741_v41 = vld [vmem:[#allocation8 + $0x184] ss:$16 sps:$4 sm:$0xff]   ;;  %v1752_v42 = vld [vmem:[#allocation8 + $0x1c8] ss:$16 sps:$4 sm:$0xff]   ;;  %v1755_v47 = vld [vmem:[#allocation8 + $0x1ac] ss:$16 sps:$4 sm:$0xff]  }
  0x63   :  { %663 = vmatprep.subr.bf16.mxu0 %v1705_v17  ;;  %704 = vmatprep.subr.bf16.mxu1 %v1725_v23  ;;  %v116_v43 = vld [vmem:[%s115_s30] sm:$0x1]  ;;  %s141_s12 = scalar_lea.vmem [#allocation7], %s2205_s24  ;;  %v1745_v49 = vld [vmem:[#allocation8 + $0x180] ss:$16 sps:$4 sm:$0xff]   ;;  %s156_s13 = scalar_lea.vmem [#allocation7], %s2207_s25  ;;  %vm2251_vm15 = vmand %vm118_vm1, %vm135_vm3 }
  0x64   :  { %v117_v44 = vpack.c.bf16 %v116_v43, %v116_v43  ;;  %v121_v45 = vld [vmem:[#allocation2] sm:$0x1]  ;;  %s173_s14 = scalar_lea.vmem [#allocation7], %s2209_s2  ;;  %v1747_v54 = vld [vmem:[#allocation8 + $0x164] ss:$16 sps:$4 sm:$0xff]   ;;  %s188_s6 = scalar_lea.vmem [#allocation7], %s2211_s28  ;;  %vm2257_vm2 = vmand %vm149_vm7, %vm167_vm5 }
  0x65   :  { %v126_v46 = vld [vmem:[%s125_s11] sm:$0x1]  ;;  %v152_v58 = vld [vmem:[#allocation2] sm:$0x2]  ;;  %vm214_vm11 = vsmask.f32 3328 }
  0x66   :  { %664 = vmatpush1.bf16.msra.mxu0 %v1709_v20  ;;  %705 = vmatpush1.bf16.msra.mxu1 %v1728_v26  ;;  %v142_v48 = vld [vmem:[%s141_s12] sm:$0x1]  ;;  %v122_v50 = vsel %vm120_vm6, %v117_v44, %v121_v45  ;;  %v1628_v56 = vpack.c.bf16 %v126_v46, %v126_v46  ;;  %v1761_v62 = vld [vmem:[#allocation8 + $0x18c] ss:$16 sps:$4 sm:$0xff]   ;;  %v184_v1 = vld [vmem:[#allocation2] sm:$0x4] }
  0x67   :  { %665 = vmatprep.subr.bf16.mxu0 %v1711_v21  ;;  %706 = vmatprep.subr.bf16.mxu1 %v1731_v27  ;;  %v1629_v51 = vpack.c.bf16 %v142_v48, %v142_v48  ;;  %v157_v52 = vld [vmem:[%s156_s13] sm:$0x1]  ;;  %123 = vst [vmem:[#allocation2] sm:$0x1] %v122_v50  ;;  %s205_s15 = scalar_lea.vmem [#allocation7], %s2213_s29  ;;  %s220_s16 = scalar_lea.vmem [#allocation7], %s2215_s0  ;;  %vm2243_vm14 = vmand %vm213_vm9, %vm214_vm11 }
  0x68   :  { %v174_v53 = vld [vmem:[%s173_s14] sm:$0x1]  ;;  %v1630_v59 = vpack.c.bf16 %v157_v52, %v157_v52  ;;  %v216_v6 = vld [vmem:[#allocation2] sm:$0x8]  ;;  %v236_v8 = vld [vmem:[#allocation11] sm:$0xff]  ;;  %v132_v16 = vshll.u32 %v1628_v56, 16 }
  0x69   :  { %v1758_v55 = vld [vmem:[#allocation8 + $0x1a8] ss:$16 sps:$4 sm:$0xff]   ;;  %v1631_v60 = vpack.c.bf16 %v174_v53, %v174_v53  ;;  %v147_v63 = vrot.slane %v1629_v51, 7  ;;  %v1751_v9 = vld [vmem:[#allocation8 + $0x160] ss:$16 sps:$4 sm:$0xff]   ;;  %v237_v13 = vpack.c.bf16 %v236_v8, %v236_v8  ;;  %vm2115_vm4 = vmmov 0  }
  0x6a   :  { %666 = vmatpush1.bf16.msra.mxu0 %v1715_v24  ;;  %707 = vmatpush1.bf16.msra.mxu1 %v1734_v30  ;;  %v189_v61 = vld [vmem:[%s188_s6] sm:$0x1]  ;;  %vm199_vm13 = vsmask.f32 7946  ;;  %v1753_v14 = vld [vmem:[#allocation8 + $0x144] ss:$16 sps:$4 sm:$0xff]  }
  0x6b   :  { %667 = vmatprep.subr.bf16.mxu0 %v1717_v25  ;;  %708 = vmatprep.subr.bf16.mxu1 %v1737_v31  ;;  %v1632_v2 = vpack.c.bf16 %v189_v61, %v189_v61  ;;  %v206_v3 = vld [vmem:[%s205_s15] sm:$0x1]  ;;  %v179_v4 = vrot.slane %v1631_v60, 6  ;;  %v153_v10 = vsel %vm2226_vm10, %v147_v63, %v152_v58  ;;  %v163_v17 = vshll.u32 %v1630_v59, 16  ;;  %v1767_v20 = vld [vmem:[#allocation8 + $0x16c] ss:$16 sps:$4 sm:$0xff]   ;;  %vm2265_vm1 = vmand %vm181_vm8, %vm199_vm13 }
  0x6c   :  { %v1633_v5 = vpack.c.bf16 %v206_v3, %v206_v3  ;;  %v221_v7 = vld [vmem:[%s220_s16] sm:$0x1]  ;;  %154 = vst [vmem:[#allocation2] sm:$0x2] %v153_v10  ;;  %vm231_vm0 = vsmask.f32 7950 }
  0x6d   :  { %v1634_v12 = vpack.c.bf16 %v221_v7, %v221_v7  ;;  %v1764_v15 = vld [vmem:[#allocation8 + $0x188] ss:$16 sps:$4 sm:$0xff]   ;;  %v185_v18 = vsel %vm2233_vm12, %v179_v4, %v184_v1  ;;  %v195_v22 = vshll.u32 %v1632_v2, 16  ;;  %238 = vst [vmem:[#allocation2 + $0x4] sm:$0xf] %v237_v13  ;;  %vm2273_vm3 = vmand %vm213_vm9, %vm231_vm0 }
  0x6e   :  { %668 = vmatpush1.bf16.msra.mxu0 %v1721_v28  ;;  %709 = vmatpush1.bf16.msra.mxu1 %v1740_v34  ;;  %v211_v19 = vrot.slane %v1633_v5, 5  ;;  %186 = vst [vmem:[#allocation2] sm:$0x4] %v185_v18  ;;  %v1757_v25 = vld [vmem:[#allocation8 + $0x140] ss:$16 sps:$4 sm:$0xff]  }
  0x6f   :  { %669 = vmatprep.subr.bf16.mxu0 %v1723_v29  ;;  %710 = vmatprep.subr.bf16.mxu1 %v1743_v35  ;;  %v137_v26 = vld [vmem:[#allocation2] sm:$0x1]  ;;  %v227_v28 = vshll.u32 %v1634_v12, 16  ;;  %v1759_v29 = vld [vmem:[#allocation8 + $0x124] ss:$16 sps:$4 sm:$0xff]   ;;  %v197_v34 = vrot.slane %v195_v22, 6 }
  0x70   :  { %v217_v24 = vsel %vm2243_vm14, %v211_v19, %v216_v6  ;;  %v1770_v30 = vld [vmem:[#allocation8 + $0x168] ss:$16 sps:$4 sm:$0xff]   ;;  %v138_v31 = vsel %vm2251_vm15, %v132_v16, %v137_v26  ;;  %v1773_v35 = vld [vmem:[#allocation8 + $0x14c] ss:$16 sps:$4 sm:$0xff]   ;;  %v1769_v46 = vld [vmem:[#allocation8 + $0x100] ss:$16 sps:$4 sm:$0xff]  }
  0x71   :  { %218 = vst [vmem:[#allocation2] sm:$0x8] %v217_v24  ;;  %139 = vst [vmem:[#allocation2] sm:$0x1] %v138_v31  ;;  %v1776_v44 = vld [vmem:[#allocation8 + $0x12c] ss:$16 sps:$4 sm:$0xff]  }
  0x72   :  { %670 = vmatpush2.bf16.msra.mxu0 %v1727_v32  ;;  %711 = vmatpush2.bf16.msra.mxu1 %v1746_v38  ;;  %v165_v32 = vrot.slane %v163_v17, 7  ;;  %v229_v38 = vrot.slane %v227_v28, 5  ;;  %v1778_v48 = vld [vmem:[#allocation8 + $0x128] ss:$16 sps:$4 sm:$0xff]   ;;  %v1782_v56 = vld [vmem:[#allocation8 + $0x2e0] ss:$16 sps:$4 sm:$0xff]  }
  0x73   :  { %671 = vmatprep.subr.bf16.mxu0 %v1729_v33  ;;  %712 = vmatprep.subr.bf16.mxu1 %v1749_v40  ;;  %v1781_v50 = vld [vmem:[#allocation8 + $0x108] ss:$16 sps:$4 sm:$0xff]   ;;  %v1790_v58 = vld [vmem:[#allocation8 + $0x2c4] ss:$16 sps:$4 sm:$0xff]   ;;  %v1793_v59 = vld [vmem:[#allocation8 + $0x2cc] ss:$16 sps:$4 sm:$0xff]  }
  0x74   :  { %v1785_v57 = vld [vmem:[#allocation8 + $0x2e8] ss:$16 sps:$4 sm:$0xff]   ;;  %v1788_v60 = vld [vmem:[#allocation8 + $0x2c0] ss:$16 sps:$4 sm:$0xff]   ;;  %v1799_v63 = vld [vmem:[#allocation8 + $0x2ac] ss:$16 sps:$4 sm:$0xff]  }
  0x75   :  { %v1791_v61 = vld [vmem:[#allocation8 + $0x2c8] ss:$16 sps:$4 sm:$0xff]   ;;  %v1794_v0 = vld [vmem:[#allocation8 + $0x2a0] ss:$16 sps:$4 sm:$0xff]   ;;  %v1802_v2 = vld [vmem:[#allocation8 + $0x284] ss:$16 sps:$4 sm:$0xff]  }
  0x76   :  { %672 = vmatpush2.bf16.msra.mxu0 %v1733_v36  ;;  %713 = vmatpush2.bf16.msra.mxu1 %v1752_v42  ;;  %v1763_v36 = vld [vmem:[#allocation8 + $0x120] ss:$16 sps:$4 sm:$0xff]   ;;  %v1775_v42 = vld [vmem:[#allocation8 + $0x148] ss:$16 sps:$4 sm:$0xff]   ;;  %v1805_v3 = vld [vmem:[#allocation8 + $0x28c] ss:$16 sps:$4 sm:$0xff]  }
  0x77   :  { %673 = vmatprep.subr.bf16.mxu0 %v1735_v37  ;;  %714 = vmatprep.subr.bf16.mxu1 %v1755_v47  ;;  %v169_v37 = vld [vmem:[#allocation2] sm:$0x2]  ;;  %v1800_v4 = vld [vmem:[#allocation8 + $0x280] ss:$16 sps:$4 sm:$0xff]   ;;  %v1808_v6 = vld [vmem:[#allocation8 + $0x264] ss:$16 sps:$4 sm:$0xff]  }
  0x78   :  { %v170_v40 = vsel %vm2257_vm2, %v165_v32, %v169_v37  ;;  %v233_v45 = vld [vmem:[#allocation2] sm:$0x8]  ;;  %v1811_v7 = vld [vmem:[#allocation8 + $0x26c] ss:$16 sps:$4 sm:$0xff]   ;;  %v1806_v8 = vld [vmem:[#allocation8 + $0x260] ss:$16 sps:$4 sm:$0xff]  }
  0x79   :  { %171 = vst [vmem:[#allocation2] sm:$0x2] %v170_v40  ;;  %v234_v47 = vsel %vm2273_vm3, %v229_v38, %v233_v45  ;;  %v1797_v1 = vld [vmem:[#allocation8 + $0x2a8] ss:$16 sps:$4 sm:$0xff]   ;;  %v1814_v10 = vld [vmem:[#allocation8 + $0x244] ss:$16 sps:$4 sm:$0xff]  }
  0x7a   :  { %674 = vmatpush2.bf16.msra.mxu0 %v1739_v39  ;;  %715 = vmatpush2.bf16.msra.mxu1 %v1758_v55  ;;  %v1765_v39 = vld [vmem:[#allocation8 + $0x104] ss:$16 sps:$4 sm:$0xff]   ;;  %235 = vst [vmem:[#allocation2] sm:$0x8] %v234_v47  ;;  %v1787_v55 = vld [vmem:[#allocation8 + $0x2ec] ss:$16 sps:$4 sm:$0xff]  }
  0x7b   :  { %675 = vmatprep.subr.bf16.mxu0 %v1741_v41  ;;  %716 = vmatprep.subr.bf16.mxu1 %v1761_v62  ;;  %v201_v41 = vld [vmem:[#allocation2] sm:$0x4]  ;;  %v1796_v62 = vld [vmem:[#allocation8 + $0x2a4] ss:$16 sps:$4 sm:$0xff]   ;;  %v1817_v11 = vld [vmem:[#allocation8 + $0x24c] ss:$16 sps:$4 sm:$0xff]  }
  0x7c   :  { %v202_v43 = vsel %vm2265_vm1, %v197_v34, %v201_v41  ;;  %v1803_v5 = vld [vmem:[#allocation8 + $0x288] ss:$16 sps:$4 sm:$0xff]   ;;  %v1812_v12 = vld [vmem:[#allocation8 + $0x240] ss:$16 sps:$4 sm:$0xff]   ;;  %v1826_v18 = vld [vmem:[#allocation8 + $0x204] ss:$16 sps:$4 sm:$0xff]  }
  0x7d   :  { %203 = vst [vmem:[#allocation2] sm:$0x4] %v202_v43  ;;  %v1815_v13 = vld [vmem:[#allocation8 + $0x248] ss:$16 sps:$4 sm:$0xff]   ;;  %v1818_v16 = vld [vmem:[#allocation8 + $0x220] ss:$16 sps:$4 sm:$0xff]  }
  0x7e   :  { %676 = vmatpush2.bf16.msra.mxu0 %v1745_v49  ;;  %717 = vmatpush2.bf16.msra.mxu1 %v1764_v15  ;;  %v1779_v49 = vld [vmem:[#allocation8 + $0x10c] ss:$16 sps:$4 sm:$0xff]   ;;  %v1821_v17 = vld [vmem:[#allocation8 + $0x228] ss:$16 sps:$4 sm:$0xff]   ;;  %v1832_v22 = vld [vmem:[#allocation8 + $0x3e4] ss:$16 sps:$4 sm:$0xff]  }
  0x7f   :  { %677 = vmatprep.subr.bf16.mxu0 %v1747_v54  ;;  %718 = vmatprep.subr.bf16.mxu1 %v1767_v20  ;;  %v1784_v54 = vld [vmem:[#allocation8 + $0x2e4] ss:$16 sps:$4 sm:$0xff]   ;;  %v1823_v15 = vld [vmem:[#allocation8 + $0x22c] ss:$16 sps:$4 sm:$0xff]   ;;  %v1824_v20 = vld [vmem:[#allocation8 + $0x200] ss:$16 sps:$4 sm:$0xff]  }
  0x80   :  { %v1829_v19 = vld [vmem:[#allocation8 + $0x20c] ss:$16 sps:$4 sm:$0xff]   ;;  %v1827_v21 = vld [vmem:[#allocation8 + $0x208] ss:$16 sps:$4 sm:$0xff]   ;;  %v1830_v24 = vld [vmem:[#allocation8 + $0x3e0] ss:$16 sps:$4 sm:$0xff]  }
  0x81   :  { %v1835_v23 = vld [vmem:[#allocation8 + $0x3ec] ss:$16 sps:$4 sm:$0xff]   ;;  %v1838_v26 = vld [vmem:[#allocation8 + $0x3c4] ss:$16 sps:$4 sm:$0xff]   ;;  %v1836_v28 = vld [vmem:[#allocation8 + $0x3c0] ss:$16 sps:$4 sm:$0xff]  }
  0x82   :  { %678 = vmatpush2.bf16.msra.mxu0 %v1751_v9  ;;  %719 = vmatpush2.bf16.msra.mxu1 %v1770_v30  ;;  %v1809_v9 = vld [vmem:[#allocation8 + $0x268] ss:$16 sps:$4 sm:$0xff]   ;;  %v1841_v27 = vld [vmem:[#allocation8 + $0x3cc] ss:$16 sps:$4 sm:$0xff]   ;;  %v1844_v30 = vld [vmem:[#allocation8 + $0x3a4] ss:$16 sps:$4 sm:$0xff]  }
  0x83   :  { %679 = vmatprep.subr.bf16.mxu0 %v1753_v14  ;;  %720 = vmatprep.subr.bf16.mxu1 %v1773_v35  ;;  %v1820_v14 = vld [vmem:[#allocation8 + $0x224] ss:$16 sps:$4 sm:$0xff]   ;;  %v1847_v31 = vld [vmem:[#allocation8 + $0x3ac] ss:$16 sps:$4 sm:$0xff]   ;;  %v1842_v32 = vld [vmem:[#allocation8 + $0x3a0] ss:$16 sps:$4 sm:$0xff]  }
  0x84   :  { %v239_v51 = vld [vmem:[#allocation2] sm:$0xff]  ;;  %v1850_v34 = vld [vmem:[#allocation8 + $0x384] ss:$16 sps:$4 sm:$0xff]   ;;  %v1854_v40 = vld [vmem:[#allocation8 + $0x360] ss:$16 sps:$4 sm:$0xff]  }
  0x85   :  { %v1481_v52 = vcombine.high %v239_v51, %v239_v51  ;;  %v1480_v53 = vcombine.low %v239_v51, %v239_v51  ;;  %v1845_v33 = vld [vmem:[#allocation8 + $0x3a8] ss:$16 sps:$4 sm:$0xff]   ;;  %v1853_v35 = vld [vmem:[#allocation8 + $0x38c] ss:$16 sps:$4 sm:$0xff]   ;;  %v1856_v38 = vld [vmem:[#allocation8 + $0x364] ss:$16 sps:$4 sm:$0xff]  }
  0x86   :  { %680 = vmatpush2.bf16.msra.mxu0 %v1757_v25  ;;  %721 = vmatpush2.bf16.msra.mxu1 %v1775_v42  ;;  %v1833_v25 = vld [vmem:[#allocation8 + $0x3e8] ss:$16 sps:$4 sm:$0xff]   ;;  %v1862_v42 = vld [vmem:[#allocation8 + $0x344] ss:$16 sps:$4 sm:$0xff]   ;;  %v1865_v43 = vld [vmem:[#allocation8 + $0x34c] ss:$16 sps:$4 sm:$0xff]  }
  0x87   :  { %681 = vmatprep.subr.bf16.mxu0 %v1759_v29  ;;  %722 = vmatprep.subr.bf16.mxu1 %v1776_v44  ;;  %v1839_v29 = vld [vmem:[#allocation8 + $0x3c8] ss:$16 sps:$4 sm:$0xff]   ;;  %v1860_v44 = vld [vmem:[#allocation8 + $0x340] ss:$16 sps:$4 sm:$0xff]   ;;  %v1871_v47 = vld [vmem:[#allocation8 + $0x32c] ss:$16 sps:$4 sm:$0xff]  }
  0x88   :  { %685 = vmatprep.mubr.bf16.mxu0 %v1481_v52  ;;  %726 = vmatprep.mubr.bf16.mxu1 %v1481_v52  ;;  %v1851_v37 = vld [vmem:[#allocation8 + $0x388] ss:$16 sps:$4 sm:$0xff]   ;;  %v1877_v51 = vld [vmem:[#allocation8 + $0x30c] ss:$16 sps:$4 sm:$0xff]   ;;  %v1872_v52 = vld [vmem:[#allocation8 + $0x300] ss:$16 sps:$4 sm:$0xff]  }
  0x89   :  { %v1857_v41 = vld [vmem:[#allocation8 + $0x368] ss:$16 sps:$4 sm:$0xff]  }
  0x8a   :  { %682 = vmatpush2.bf16.msra.mxu0 %v1763_v36  ;;  %723 = vmatpush2.bf16.msra.mxu1 %v1778_v48  ;;  %v1848_v36 = vld [vmem:[#allocation8 + $0x380] ss:$16 sps:$4 sm:$0xff]   ;;  %v1863_v45 = vld [vmem:[#allocation8 + $0x348] ss:$16 sps:$4 sm:$0xff]  }
  0x8b   :  { %683 = vmatprep.subr.bf16.mxu0 %v1765_v39  ;;  %724 = vmatprep.subr.bf16.mxu1 %v1779_v49  ;;  %v1859_v39 = vld [vmem:[#allocation8 + $0x36c] ss:$16 sps:$4 sm:$0xff]   ;;  %v1866_v48 = vld [vmem:[#allocation8 + $0x320] ss:$16 sps:$4 sm:$0xff]   ;;  %v1869_v49 = vld [vmem:[#allocation8 + $0x328] ss:$16 sps:$4 sm:$0xff]  }
  0x8e   :  { %684 = vmatpush2.bf16.msra.mxu0 %v1769_v46  ;;  %725 = vmatpush2.bf16.msra.mxu1 %v1781_v50  ;;  %v1868_v46 = vld [vmem:[#allocation8 + $0x324] ss:$16 sps:$4 sm:$0xff]  }
  0x8f   :  { %1184 = vmatprep.subr.bf16.mxu0 %v1784_v54  ;;  %1225 = vmatprep.subr.bf16.mxu1 %v1787_v55  ;;  %v1874_v50 = vld [vmem:[#allocation8 + $0x304] ss:$16 sps:$4 sm:$0xff]   ;;  %v306_v54 = vlaneseq }
  0x91   :  { %686 = vmatmul.mubr.bf16.vlgmr.msra.gmra.mxu0 %v1480_v53  ;;  %727 = vmatmul.mubr.bf16.vlgmr.msra.gmra.mxu1 %v1480_v53  ;;  %v1875_v53 = vld [vmem:[#allocation8 + $0x308] ss:$16 sps:$4 sm:$0xff]   ;;  %v2283_v55 = vshrl.u32 %v306_v54, 7 }
  0x92   :  { %1185 = vmatpush1.bf16.msra.mxu0 %v1782_v56  ;;  %1226 = vmatpush1.bf16.msra.mxu1 %v1785_v57  ;;  %v304_v57 = vld [vmem:[%s2353_s3] sm:$0xf] }
  0x93   :  { %1186 = vmatprep.subr.bf16.mxu0 %v1790_v58  ;;  %1227 = vmatprep.subr.bf16.mxu1 %v1793_v59  ;;  %v308_v56 = vsub.s32 0, %v2283_v55  ;;  %v312_v58 = vsub.s32 1, %v2283_v55 }
  0x95   :  { %v309_v59 = vrot.slane %v304_v57, %v308_v56 }
  0x96   :  { %1187 = vmatpush1.bf16.msra.mxu0 %v1788_v60  ;;  %1228 = vmatpush1.bf16.msra.mxu1 %v1791_v61  ;;  %v313_v60 = vrot.slane %v304_v57, %v312_v58 }
  0x97   :  { %1188 = vmatprep.subr.bf16.mxu0 %v1796_v62  ;;  %1229 = vmatprep.subr.bf16.mxu1 %v1799_v63 }
  0x9a   :  { %1189 = vmatpush1.bf16.msra.mxu0 %v1794_v0  ;;  %1230 = vmatpush1.bf16.msra.mxu1 %v1797_v1 }
  0x9b   :  { %1190 = vmatprep.subr.bf16.mxu0 %v1802_v2  ;;  %1231 = vmatprep.subr.bf16.mxu1 %v1805_v3 }
  0x9e   :  { %1191 = vmatpush1.bf16.msra.mxu0 %v1800_v4  ;;  %1232 = vmatpush1.bf16.msra.mxu1 %v1803_v5  ;;  %v320_v4 = vsub.s32 3, %v2283_v55 }
  0x9f   :  { %1192 = vmatprep.subr.bf16.mxu0 %v1808_v6  ;;  %1233 = vmatprep.subr.bf16.mxu1 %v1811_v7 }
  0xa2   :  { %1193 = vmatpush1.bf16.msra.mxu0 %v1806_v8  ;;  %1234 = vmatpush1.bf16.msra.mxu1 %v1809_v9  ;;  %v316_v9 = vsub.s32 2, %v2283_v55 }
  0xa3   :  { %1194 = vmatprep.subr.bf16.mxu0 %v1814_v10  ;;  %1235 = vmatprep.subr.bf16.mxu1 %v1817_v11  ;;  %v321_v10 = vrot.slane %v304_v57, %v320_v4 }
  0xa6   :  { %1195 = vmatpush1.bf16.msra.mxu0 %v1812_v12  ;;  %1236 = vmatpush1.bf16.msra.mxu1 %v1815_v13  ;;  %v317_v12 = vrot.slane %v304_v57, %v316_v9 }
  0xa7   :  { %1196 = vmatprep.subr.bf16.mxu0 %v1820_v14  ;;  %1237 = vmatprep.subr.bf16.mxu1 %v1823_v15 }
  0xaa   :  { %1197 = vmatpush1.bf16.msra.mxu0 %v1818_v16  ;;  %1238 = vmatpush1.bf16.msra.mxu1 %v1821_v17 }
  0xab   :  { %1198 = vmatprep.subr.bf16.mxu0 %v1826_v18  ;;  %1239 = vmatprep.subr.bf16.mxu1 %v1829_v19 }
  0xae   :  { %1199 = vmatpush1.bf16.msra.mxu0 %v1824_v20  ;;  %1240 = vmatpush1.bf16.msra.mxu1 %v1827_v21 }
  0xaf   :  { %1200 = vmatprep.subr.bf16.mxu0 %v1832_v22  ;;  %1241 = vmatprep.subr.bf16.mxu1 %v1835_v23  ;;  %v754_v23 = vld [vmem:[#allocation13] sm:$0xff] }
  0xb2   :  { %1201 = vmatpush2.bf16.msra.mxu0 %v1830_v24  ;;  %1242 = vmatpush2.bf16.msra.mxu1 %v1833_v25 }
  0xb3   :  { %1202 = vmatprep.subr.bf16.mxu0 %v1838_v26  ;;  %1243 = vmatprep.subr.bf16.mxu1 %v1841_v27 }
  0xb6   :  { %1203 = vmatpush2.bf16.msra.mxu0 %v1836_v28  ;;  %1244 = vmatpush2.bf16.msra.mxu1 %v1839_v29 }
  0xb7   :  { %1204 = vmatprep.subr.bf16.mxu0 %v1844_v30  ;;  %1245 = vmatprep.subr.bf16.mxu1 %v1847_v31  ;;  %v765_v31 = vld [vmem:[#allocation11 + $0x8] sm:$0xff] }
  0xba   :  { %1205 = vmatpush2.bf16.msra.mxu0 %v1842_v32  ;;  %1246 = vmatpush2.bf16.msra.mxu1 %v1845_v33 }
  0xbb   :  { %1206 = vmatprep.subr.bf16.mxu0 %v1850_v34  ;;  %1247 = vmatprep.subr.bf16.mxu1 %v1853_v35  ;;  %v1919_v35 = vpack.c.bf16 %v765_v31, %v765_v31 }
  0xbd   :  { %1216 = vmatprep.mubr.bf16.mxu0 %v1919_v35  ;;  %1257 = vmatprep.mubr.bf16.mxu1 %v1919_v35 }
  0xbe   :  { %1207 = vmatpush2.bf16.msra.mxu0 %v1848_v36  ;;  %1248 = vmatpush2.bf16.msra.mxu1 %v1851_v37  ;;  %v1878_v36 = vld [vmem:[%s2354_s4 + $0x38] sm:$0xff]   ;;  %v2114_v37 = vmov 0.0  }
  0xbf   :  { %1208 = vmatprep.subr.bf16.mxu0 %v1856_v38  ;;  %1249 = vmatprep.subr.bf16.mxu1 %v1859_v39  ;;  %v1879_v38 = vld [vmem:[%s2354_s4 + $0x30] sm:$0xff]   ;;  %v1880_v39 = vld [vmem:[%s2354_s4 + $0x28] sm:$0xff]  }
  0xc2   :  { %1209 = vmatpush2.bf16.msra.mxu0 %v1854_v40  ;;  %1250 = vmatpush2.bf16.msra.mxu1 %v1857_v41  ;;  %v1881_v40 = vld [vmem:[%s2354_s4 + $0x20] sm:$0xff]   ;;  %v1882_v41 = vld [vmem:[%s2354_s4 + $0x18] sm:$0xff]  }
  0xc3   :  { %1210 = vmatprep.subr.bf16.mxu0 %v1862_v42  ;;  %1251 = vmatprep.subr.bf16.mxu1 %v1865_v43  ;;  %v1883_v42 = vld [vmem:[%s2354_s4 + $0x10] sm:$0xff]   ;;  %v1884_v43 = vld [vmem:[%s2354_s4 + $0x8] sm:$0xff]  }
  0xc6   :  { %1211 = vmatpush2.bf16.msra.mxu0 %v1860_v44  ;;  %1252 = vmatpush2.bf16.msra.mxu1 %v1863_v45  ;;  %v1885_v44 = vld [vmem:[%s2354_s4] sm:$0xff]  }
  0xc7   :  { %1212 = vmatprep.subr.bf16.mxu0 %v1868_v46  ;;  %1253 = vmatprep.subr.bf16.mxu1 %v1871_v47  ;;  %v1549_v45 = vld [vmem:[%s2353_s3 + $0x4] sm:$0xf]  ;;  %s2116_s3 = smov [#allocation15]  }
  0xc8   :  { %v840_v46 = vrot.slane %v1549_v45, %v308_v56  ;;  %v844_v47 = vrot.slane %v1549_v45, %v312_v58  ;;  %v852_v56 = vrot.slane %v1549_v45, %v320_v4  ;;  %v848_v58 = vrot.slane %v1549_v45, %v316_v9  ;;  %s1424_s4 = sshll.u32 %s2116_s3, 4  ;;  %s1425_s4 = int_to_ptr.vmem [resolvable:$true] %s1424_s4 }
  0xc9   :  { %s2032_s14 = scalar_lea.vmem %s1425_s4, 256  ;;  %p2037_p3 = scmp.lt.s32.totalorder %s1425_s4, %s1425_s4 }
  0xca   :  { %1213 = vmatpush2.bf16.msra.mxu0 %v1866_v48  ;;  %1254 = vmatpush2.bf16.msra.mxu1 %v1869_v49  ;;  %p2033_p2 = scmp.ne.s32.totalorder %s1425_s4, %s2032_s14  ;;  %p2038_p4 = scmp.lt.s32.totalorder %s2032_s14, %s2032_s14 }
  0xcb   :  { %1214 = vmatprep.subr.bf16.mxu0 %v1874_v50  ;;  %1255 = vmatprep.subr.bf16.mxu1 %v1877_v51 }
  0xcc   :  { %p2039_p5 = por %p2038_p4, %p2037_p3 }
  0xce   :  { %1215 = vmatpush2.bf16.msra.mxu0 %v1872_v52  ;;  %1256 = vmatpush2.bf16.msra.mxu1 %v1875_v53  ;;  %p2040_p6 = pnand %p2039_p5, %p2033_p2 }
  0xcf   :  { %1649 = vmatprep.subr.bf16.mxu0 %v2114_v37 }
 0x151   :  { %v687_v61 = vpop.f32.mrf.mxu0  ;;  %v728_v0 = vpop.f32.mrf.mxu1 }
 0x152   :  { %v688_v62 = vadd.f32 %v687_v61, %v309_v59  ;;  %v729_v14 = vadd.f32 %v728_v0, %v317_v12 }
 0x153   :  { %v689_v63 = vpop.f32.mrf.mxu0  ;;  %v730_v5 = vpop.f32.mrf.mxu1 }
 0x154   :  { %v1546_v1 = vmul.f32 -1.442695, %v688_v62  ;;  %v690_v2 = vadd.f32 %v689_v63, %v313_v60  ;;  %v731_v13 = vadd.f32 %v730_v5, %v321_v10  ;;  %v1286_v10 = vld [vmem:[#allocation13 + $0x8] sm:$0xff] }
 0x155   :  { %v691_v3 = vpop.f32.mrf.mxu0  ;;  %v732_v8 = vpop.f32.mrf.mxu1 }
 0x156   :  { %1886 = vpow2.f32 %v1546_v1  ;;  %v1547_v6 = vmul.f32 -1.442695, %v690_v2  ;;  %v1548_v15 = vmul.f32 -1.442695, %v731_v13 }
 0x157   :  { %v692_v7 = vpop.f32.mrf.mxu0  ;;  %v733_v11 = vpop.f32.mrf.mxu1 }
 0x158   :  { %1888 = vpow2.f32 %v1547_v6 }
 0x159   :  { %1890 = vtanh.f32 %v729_v14 }
 0x15a   :  { %1892 = vpow2.f32 %v1548_v15 }
 0x163   :  { %v1887_v16 = vpop.eup %1886 }
 0x164   :  { %v738_v17 = vadd.f32 1.0, %v1887_v16 }
 0x165   :  { %v1889_v18 = vpop.eup %1888 }
 0x166   :  { %1894 = vrcp.f32 %v738_v17  ;;  %v744_v19 = vadd.f32 1.0, %v1889_v18  ;;  %v1891_v20 = vpop.eup %1890 }
 0x167   :  { %v1893_v21 = vpop.eup %1892 }
 0x168   :  { %1896 = vrcp.f32 %v744_v19  ;;  %v751_v25 = vadd.f32 1.0, %v1893_v21 }
 0x16a   :  { %1898 = vrcp.f32 %v751_v25 }
 0x173   :  { %v1895_v22 = vpop.eup %1894 }
 0x174   :  { %v756_v27 = vmul.f32 %v1895_v22, %v1891_v20 }
 0x175   :  { %v1897_v24 = vpop.eup %1896 }
 0x176   :  { %v755_v26 = vmul.f32 %v1897_v24, %v754_v23 }
 0x177   :  { %v1899_v29 = vpop.eup %1898 }
 0x178   :  { %v757_v28 = vadd.f32 %v756_v27, %v755_v26 }
 0x17a   :  { %1900 = vtanh.f32 %v757_v28  ;;  %761 = vst [vmem:[#allocation17] sm:$0xff] %v757_v28 }
 0x187   :  { %v1901_v30 = vpop.eup %1900 }
 0x188   :  { %v759_v32 = vmul.f32 %v1901_v30, %v1899_v29 }
 0x18a   :  { %v1638_v33 = vpack.c.bf16 %v765_v31, %v759_v32  ;;  %760 = vst [vmem:[#allocation15] sm:$0xff] %v759_v32  ;;  %v1918_v34 = vpack.c.bf16 %v759_v32, %v759_v32 }
 0x18c   :  { %1639 = vst [vmem:[#allocation2] sm:$0xff] %v1638_v33   ;;  %1217 = vmatmul.mubr.bf16.vlgmr.msra.gmra.mxu0 %v1918_v34  ;;  %1258 = vmatmul.mubr.bf16.vlgmr.msra.gmra.mxu1 %v1918_v34 }
 0x18d   :  { %1650 = vmatpush3.bf16.msra.mxu0 %v1878_v36  ;;  %1665 = vmatprep.mubr.msk.bf16.mxu0 %vm2115_vm4, %v2114_v37 }
 0x18e   :  { %1651 = vmatprep.subr.bf16.mxu0 %v2114_v37 }
 0x191   :  { %1652 = vmatpush3.bf16.msra.mxu0 %v1879_v38 }
 0x192   :  { %1653 = vmatprep.subr.bf16.mxu0 %v2114_v37 }
 0x195   :  { %1654 = vmatpush3.bf16.msra.mxu0 %v1880_v39 }
 0x196   :  { %1655 = vmatprep.subr.bf16.mxu0 %v2114_v37 }
 0x199   :  { %1656 = vmatpush3.bf16.msra.mxu0 %v1881_v40 }
 0x19a   :  { %1657 = vmatprep.subr.bf16.mxu0 %v2114_v37 }
 0x19d   :  { %1658 = vmatpush3.bf16.msra.mxu0 %v1882_v41 }
 0x19e   :  { %1659 = vmatprep.subr.bf16.mxu0 %v2114_v37 }
 0x1a1   :  { %1660 = vmatpush3.bf16.msra.mxu0 %v1883_v42 }
 0x1a2   :  { %1661 = vmatprep.subr.bf16.mxu0 %v2114_v37 }
 0x1a5   :  { %1662 = vmatpush3.bf16.msra.mxu0 %v1884_v43 }
 0x1a6   :  { %1663 = vmatprep.subr.bf16.mxu0 %v2114_v37 }
 0x1a9   :  { %1664 = vmatpush3.bf16.msra.mxu0 %v1885_v44 }
 0x24c   :  { %v1218_v48 = vpop.f32.mrf.mxu0  ;;  %v1259_v49 = vpop.f32.mrf.mxu1 }
 0x24d   :  { %v1219_v50 = vadd.f32 %v1218_v48, %v840_v46  ;;  %v1260_v2 = vadd.f32 %v1259_v49, %v848_v58 }
 0x24e   :  { %v1220_v51 = vpop.f32.mrf.mxu0  ;;  %v1261_v52 = vpop.f32.mrf.mxu1 }
 0x24f   :  { %v1616_v53 = vmul.f32 -1.442695, %v1219_v50  ;;  %v1221_v54 = vadd.f32 %v1220_v51, %v844_v47  ;;  %v1262_v63 = vadd.f32 %v1261_v52, %v852_v56 }
 0x250   :  { %v1222_v57 = vpop.f32.mrf.mxu0  ;;  %v1263_v59 = vpop.f32.mrf.mxu1 }
 0x251   :  { %1902 = vpow2.f32 %v1616_v53  ;;  %v1617_v60 = vmul.f32 -1.442695, %v1221_v54  ;;  %v1618_v0 = vmul.f32 -1.442695, %v1262_v63 }
 0x252   :  { %v1223_v61 = vpop.f32.mrf.mxu0  ;;  %v1264_v62 = vpop.f32.mrf.mxu1 }
 0x253   :  { %1904 = vpow2.f32 %v1617_v60 }
 0x254   :  { %1906 = vpow2.f32 %v1618_v0 }
 0x25e   :  { %v1903_v1 = vpop.eup %1902 }
 0x25f   :  { %v1269_v3 = vadd.f32 1.0, %v1903_v1 }
 0x260   :  { %v1905_v5 = vpop.eup %1904 }
 0x261   :  { %1908 = vrcp.f32 %v1269_v3  ;;  %v1275_v6 = vadd.f32 1.0, %v1905_v5  ;;  %v1907_v7 = vpop.eup %1906 }
 0x262   :  { %1910 = vtanh.f32 %v1260_v2  ;;  %v1282_v4 = vadd.f32 1.0, %v1907_v7 }
 0x263   :  { %1912 = vrcp.f32 %v1275_v6 }
 0x264   :  { %1914 = vrcp.f32 %v1282_v4 }
 0x26e   :  { %v1909_v8 = vpop.eup %1908 }
 0x26f   :  { %v1911_v11 = vpop.eup %1910 }
 0x270   :  { %v1913_v12 = vpop.eup %1912  ;;  %v1288_v13 = vmul.f32 %v1911_v11, %v1909_v8 }
 0x271   :  { %v1287_v14 = vmul.f32 %v1913_v12, %v1286_v10  ;;  %v1915_v9 = vpop.eup %1914 }
 0x273   :  { %v1289_v55 = vadd.f32 %v1288_v13, %v1287_v14 }
 0x275   :  { %1295 = vst [vmem:[#allocation17 + $0x8] sm:$0xff] %v1289_v55  ;;  %1916 = vtanh.f32 %v1289_v55 }
 0x282   :  { %v1917_v15 = vpop.eup %1916 }
 0x283   :  { %v1291_v16 = vmul.f32 %v1917_v15, %v1915_v9 }
 0x285   :  { %v1296_v17 = vpack.c.bf16 %v1291_v16, %v1291_v16  ;;  %1293 = vst [vmem:[#allocation15 + $0x8] sm:$0xff] %v1291_v16 }
 0x287   :  { %1666 = vmatmul.mubr.bf16.vlgmr.msra.gmra.mxu0 %v1296_v17 }
 0x288   :  { %2043 = shalt.err (!%p2040_p6)
}
 0x289   :  { %1430 = dma.vmem_to_hbm [thread:$0]  %s1425_s4, 256, %s2359_s9, [#allocation16], %s2108_s26, %s2108_s26, %s2109_s27  }
 0x28a   :  { %s2117_s16 = smov [#allocation17]  }
 0x28b   :  { %s1436_s17 = sshll.u32 %s2117_s16, 4  ;;  %s1437_s17 = int_to_ptr.vmem [resolvable:$true] %s1436_s17 }
 0x28c   :  { %s2052_s18 = scalar_lea.vmem %s1437_s17, 256  ;;  %p2057_p8 = scmp.lt.s32.totalorder %s1437_s17, %s1437_s17 }
 0x28d   :  { %p2053_p7 = scmp.ne.s32.totalorder %s1437_s17, %s2052_s18  ;;  %p2058_p9 = scmp.lt.s32.totalorder %s2052_s18, %s2052_s18 }
 0x28f   :  { %p2059_p10 = por %p2058_p9, %p2057_p8 }
 0x291   :  { %p2060_p11 = pnand %p2059_p10, %p2053_p7 }
 0x293   :  { %2063 = shalt.err (!%p2060_p11)
}
 0x294   :  { %1442 = dma.vmem_to_hbm [thread:$0]  %s1437_s17, 256, %s2360_s10, [#allocation16], %s2108_s26, %s2108_s26, %s2109_s27   ;;  %v1619_v18 = vld [vmem:[#allocation10] ss:$0 sm:$0xff] }
 0x295   :  { %s2118_s21 = smov [#allocation14]  }
 0x296   :  { %s1415_s9 = sshll.u32 %s2118_s21, 4  ;;  %s1416_s9 = int_to_ptr.vmem [resolvable:$true] %s1415_s9 }
 0x297   :  { %s2072_s22 = scalar_lea.vmem %s1416_s9, 128  ;;  %p2077_p13 = scmp.lt.s32.totalorder %s1416_s9, %s1416_s9 }
 0x298   :  { %p2073_p12 = scmp.ne.s32.totalorder %s1416_s9, %s2072_s22  ;;  %p2078_p0 = scmp.lt.s32.totalorder %s2072_s22, %s2072_s22 }
 0x29a   :  { %p2079_p1 = por %p2078_p0, %p2077_p13 }
 0x29c   :  { %p2080_p2 = pnand %p2079_p1, %p2073_p12 }
 0x347   :  { %v1402_v19 = vpop.f32.mrf.mxu0 }
 0x348   :  { %v1403_v20 = vadd.f32 %v1619_v18, %v1402_v19 }
 0x349   :  { %v1667_v21 = vpop.f32.mrf.mxu0 }
 0x34a   :  { %1408 = vst [vmem:[#allocation14] sm:$0xff] %v1403_v20 }
 0x34b   :  { %v1405_v22 = vpop.f32.mrf.mxu0 }
 0x34c   :  { %2083 = shalt.err (!%p2080_p2)
}
 0x34d   :  { %1418 = dma.vmem_to_hbm [thread:$0]  %s1416_s9, 128, %s2358_s8, [#allocation5]   ;;  %v1668_v23 = vpop.f32.mrf.mxu0 }
 0x34e   :  { %2100 = dma.done.wait [#allocation5], 128  }
 0x34f   :  { %2101 = vsyncadd [#allocation5], 4294967168 }
 0x350   :  { %2102 = dma.done.wait [#allocation16], 512  }
 0x351   :  { %2103 = vsyncadd [#allocation16], 4294966784 }
 0x352   :  { %1452 = vsyncpa [#allocation4], 1 }
 0x353   :  { %1453 = vsyncpa [#allocation9], 1 }
 0x354   :  { %1454 = vsyncpa [#allocation12], 1 }
 0x355   :  { %1455 = vsyncpa [#allocation5], 1 }
 0x356   :  { %1456 = vsyncpa [#allocation16], 1 }
 0x357   :  { %1457 = vsyncpa [#allocation6], 1 }

</bundles_post_ra>
